<compile_context>
chip_gen: v7x
topology: tpu7x:2x2x1
jax: 0.10.0
libtpu: 0.0.40
codegen_flags: <defaults>
</compile_context>

<pallas_src>
import jax
import jax.numpy as jnp
from jax.experimental import pallas as pl
from jax.experimental.pallas import tpu as pltpu

D_IN = 768
D_HID = 384


def adapter_kernel(x_ref, w1_ref, w2_ref, o_ref):
    # x_ref : (tm, 768)   input tile (f32 or bf16)
    # w1_ref: (768, 384)  bf16, [K, N] MXU-native layout (resident across grid)
    # w2_ref: (384, 768)  bf16, [K, N] MXU-native layout (resident across grid)
    # o_ref : (tm, 768)   output tile (same dtype as input)
    x = x_ref[...].astype(jnp.bfloat16)

    # h[m, n] = sum_k x[m, k] * w1[k, n]  -- f32 accumulate on the MXU
    h = jnp.dot(x, w1_ref[...], preferred_element_type=jnp.float32)
    h = jnp.maximum(h, 0.0)                                   # ReLU (VPU)

    # y[m, n] = sum_k h[m, k] * w2[k, n]
    y = jnp.dot(h.astype(jnp.bfloat16), w2_ref[...],
                preferred_element_type=jnp.float32)
    y = jnp.maximum(y, 0.0)                                   # ReLU (VPU)

    o_ref[...] = y.astype(o_ref.dtype)


def _round_up(a, b):
    return ((a + b - 1) // b) * b


def adapter_forward(x, w1, w2, *, tm=512):
    """Forward pass of the Adapter.

    x : (N, 768)  f32 or bf16 activations (output dtype matches x).
    w1: (384, 768) first Linear weight, PyTorch (out, in) layout.
    w2: (768, 384) second Linear weight, PyTorch (out, in) layout.
    """
    N, d = x.shape
    assert d == D_IN and w1.shape == (D_HID, D_IN) and w2.shape == (D_IN, D_HID)

    # One-time weight prep (const-foldable under jit): bf16 + [K, N] layout so the
    # MXU is fed natively and no per-step cast/transpose happens in the kernel.
    w1_kn = w1.T.astype(jnp.bfloat16)        # (768, 384)
    w2_kn = w2.T.astype(jnp.bfloat16)        # (384, 768)

    # Row tile: multiple of 8 (f32/bf16 sublane tiling), no bigger than the batch.
    tm_eff = max(8, min(tm, _round_up(N, 8)))
    # Keep >= 2 grid steps for mid/large batches so v7x's two TensorCores both
    # get work from the "parallel" row axis.
    if N > 256:
        tm_eff = min(tm_eff, max(256, _round_up(pl.cdiv(N, 2), 8)))

    grid = (pl.cdiv(N, tm_eff),)             # ragged last tile masked by Pallas

    flops = 2 * N * D_IN * D_HID * 2                         # two GEMMs
    bytes_accessed = (N * D_IN * x.dtype.itemsize * 2        # x in + out
                      + 2 * D_HID * D_IN * 2)                # bf16 weights, once

    return pl.pallas_call(
        adapter_kernel,
        out_shape=jax.ShapeDtypeStruct((N, D_IN), x.dtype),
        grid_spec=pltpu.PrefetchScalarGridSpec(
            num_scalar_prefetch=0,
            grid=grid,
            in_specs=[
                pl.BlockSpec((tm_eff, D_IN), lambda i: (i, 0)),   # x (streamed)
                pl.BlockSpec((D_IN, D_HID), lambda i: (0, 0)),    # w1 (resident)
                pl.BlockSpec((D_HID, D_IN), lambda i: (0, 0)),    # w2 (resident)
            ],
            out_specs=pl.BlockSpec((tm_eff, D_IN), lambda i: (i, 0)),
        ),
        compiler_params=pltpu.CompilerParams(
            dimension_semantics=("parallel",),
            # Raise v5e's 16 MiB scoped default; tm=512..1024 f32 tiles +
            # double-buffers + bf16 weights stay well under this (and under
            # v7x's 64 MiB physical VMEM).
            vmem_limit_bytes=32 * 1024 * 1024,
        ),
        cost_estimate=pl.CostEstimate(flops=flops, transcendentals=0,
                                      bytes_accessed=bytes_accessed),
    )(x, w1_kn, w2_kn)


def reference_forward(x, w1, w2):
    h = jnp.maximum(x @ w1.T, 0.0)
    return jnp.maximum(h @ w2.T, 0.0)


if __name__ == "__main__":
    key = jax.random.PRNGKey(0)
    kx, k1, k2 = jax.random.split(key, 3)

    N = 16  # small batch for the demo (ragged vs tm handled by masked writeback)
    x = jax.random.normal(kx, (N, D_IN), dtype=jnp.float32)
    # Deterministic weight init (PyTorch Linear layout: (out, in)).
    bound1 = 1.0 / (D_IN ** 0.5)
    bound2 = 1.0 / (D_HID ** 0.5)
    w1 = jax.random.uniform(k1, (D_HID, D_IN), minval=-bound1, maxval=bound1,
                            dtype=jnp.float32)
    w2 = jax.random.uniform(k2, (D_IN, D_HID), minval=-bound2, maxval=bound2,
                            dtype=jnp.float32)

    out = adapter_forward(x, w1, w2)
    out = jax.block_until_ready(out)

    ref = reference_forward(x, w1, w2)
    assert out.shape == (N, D_IN)
    # bf16 MXU operands (f32 accumulation) -> relaxed tolerance vs f32 reference.
    assert jnp.allclose(out, ref, atol=3e-2, rtol=2e-2), "mismatch vs reference"

    print("KERNEL_OK")
</pallas_src>

<mosaic_0001>
module attributes {stable_mosaic.version = 11 : i64} {
  func.func @adapter_kernel(%arg0: i32, %arg1: memref<16x768xf32, #tpu.memory_space<vmem>>, %arg2: memref<768x384xbf16, #tpu.memory_space<vmem>>, %arg3: memref<384x768xbf16, #tpu.memory_space<vmem>>, %arg4: memref<16x768xf32, #tpu.memory_space<vmem>>) attributes {dimension_semantics = [#tpu.dimension_semantics<parallel>], iteration_bounds = array<i64: 1>, scalar_prefetch = 0 : i64, scratch_operands = 0 : i64, tpu.core_type = #tpu.core_type<tc>, window_params = [{transform_indices = @transform_0, window_bounds = array<i64: 16, 768>}, {pipeline_mode = #tpu.pipeline_mode<synchronous>, transform_indices = @transform_1, window_bounds = array<i64: 768, 384>}, {pipeline_mode = #tpu.pipeline_mode<synchronous>, transform_indices = @transform_2, window_bounds = array<i64: 384, 768>}, {transform_indices = @transform_3, window_bounds = array<i64: 16, 768>}]} {
    %c0 = arith.constant 0 : index
    %c0_0 = arith.constant 0 : index
    %0 = vector.load %arg1[%c0, %c0_0] : memref<16x768xf32, #tpu.memory_space<vmem>>, vector<16x768xf32>
    %1 = arith.truncf %0 : vector<16x768xf32> to vector<16x768xbf16>
    %c0_1 = arith.constant 0 : index
    %c0_2 = arith.constant 0 : index
    %2 = vector.load %arg2[%c0_1, %c0_2] : memref<768x384xbf16, #tpu.memory_space<vmem>>, vector<768x384xbf16>
    %cst = arith.constant dense<0.000000e+00> : vector<16x384xf32>
    %3 = tpu.matmul %1, %2, %cst {dimension_numbers = #tpu.dot_dimension_numbers<[1], [0], [0], [1], [0, 0, 1, 1], [], []>} : vector<16x768xbf16>, vector<768x384xbf16>, vector<16x384xf32> -> vector<16x384xf32>
    %cst_3 = arith.constant 0.000000e+00 : f32
    %4 = vector.broadcast %cst_3 : f32 to vector<16x384xf32>
    %5 = arith.maximumf %3, %4 : vector<16x384xf32>
    %6 = arith.truncf %5 : vector<16x384xf32> to vector<16x384xbf16>
    %c0_4 = arith.constant 0 : index
    %c0_5 = arith.constant 0 : index
    %7 = vector.load %arg3[%c0_4, %c0_5] : memref<384x768xbf16, #tpu.memory_space<vmem>>, vector<384x768xbf16>
    %cst_6 = arith.constant dense<0.000000e+00> : vector<16x768xf32>
    %8 = tpu.matmul %6, %7, %cst_6 {dimension_numbers = #tpu.dot_dimension_numbers<[1], [0], [0], [1], [0, 0, 1, 1], [], []>} : vector<16x384xbf16>, vector<384x768xbf16>, vector<16x768xf32> -> vector<16x768xf32>
    %cst_7 = arith.constant 0.000000e+00 : f32
    %9 = vector.broadcast %cst_7 : f32 to vector<16x768xf32>
    %10 = arith.maximumf %8, %9 : vector<16x768xf32>
    %c0_8 = arith.constant 0 : index
    %c0_9 = arith.constant 0 : index
    %11 = vector.load %arg4[%c0_8, %c0_9] : memref<16x768xf32, #tpu.memory_space<vmem>>, vector<16x768xf32>
    tpu.vector_store %arg4[%c0_8, %c0_9], %10 {strides = array<i32>} : memref<16x768xf32, #tpu.memory_space<vmem>>, vector<16x768xf32>,
    return
  }
  func.func @transform_0(%arg0: i32) -> (i32, i32) {
    %c0_i32 = arith.constant 0 : i32
    %c0_i32_0 = arith.constant 0 : i32
    return %arg0, %c0_i32 : i32, i32
  }
  func.func @transform_1(%arg0: i32) -> (i32, i32) {
    %c0_i32 = arith.constant 0 : i32
    %c0_i32_0 = arith.constant 0 : i32
    %c0_i32_1 = arith.constant 0 : i32
    return %c0_i32, %c0_i32_0 : i32, i32
  }
  func.func @transform_2(%arg0: i32) -> (i32, i32) {
    %c0_i32 = arith.constant 0 : i32
    %c0_i32_0 = arith.constant 0 : i32
    %c0_i32_1 = arith.constant 0 : i32
    return %c0_i32, %c0_i32_0 : i32, i32
  }
  func.func @transform_3(%arg0: i32) -> (i32, i32) {
    %c0_i32 = arith.constant 0 : i32
    %c0_i32_0 = arith.constant 0 : i32
    return %arg0, %c0_i32 : i32, i32
  }
}

</mosaic_0001>

<bundles_post_ra>
// kernel: tpu_custom_call.1
= control target key start
LH: loop header
LB: loop body
LE: loop exit
PB: predicated region body
PF: predicated region fallthrough
CT: control target
= control target key end

     0   :  { %8 = vsyncpa [#allocation3], 0  ;;  %s3458_s0 = inlined_call_operand.hbm [shape: f32[16,768], index: 0, kind: input, shape index: {}]   ;;  %s3459_s1 = inlined_call_operand.hbm [shape: bf16[768,384], index: 1, kind: input, shape index: {}]   ;;  %s3460_s2 = inlined_call_operand.hbm [shape: bf16[384,768], index: 2, kind: input, shape index: {}]   ;;  %s3461_s3 = inlined_call_operand.hbm [shape: f32[16,768], index: 3, kind: output, shape index: {}]  }
   0x1   :  { %9 = vsyncpa [#allocation6], 0 }
   0x2   :  { %10 = vsyncpa [#allocation4], 0  ;;  %s3347_s12 = smov [#allocation5]   ;;  %s3253_s16 = scalar_lea.hbm %s3459_s1, 18432 }
   0x3   :  { %s28_s13 = sshll.u32 %s3347_s12, 4  ;;  %p3254_p0 = scmp.ne.s32.totalorder %s3459_s1, %s3253_s16  ;;  %s29_s13 = int_to_ptr.vmem [resolvable:$true] %s28_s13 }
   0x4   :  { %p3257_p1 = scmp.lt.u32.totalorder %s3253_s16, %s3459_s1 }
   0x6   :  { %p3259_p2 = pnand %p3257_p1, %p3254_p0 }
   0x8   :  { %3262 = shalt.err (!%p3259_p2)
}
   0x9   :  { %s3263_s21 = scalar_lea.vmem %s29_s13, 18432  ;;  %p3268_p4 = scmp.lt.s32.totalorder %s29_s13, %s29_s13 }
   0xa   :  { %p3264_p3 = scmp.ne.s32.totalorder %s29_s13, %s3263_s21  ;;  %p3269_p5 = scmp.lt.s32.totalorder %s3263_s21, %s3263_s21 }
   0xc   :  { %p3270_p6 = por %p3269_p5, %p3268_p4 }
   0xe   :  { %p3271_p7 = pnand %p3270_p6, %p3264_p3 }
  0x10   :  { %3274 = shalt.err (!%p3271_p7)
}
  0x11   :  { %s3348_s22 = smov 192   ;;  %s3349_s23 = smov 12  }
  0x12   :  { %34 = dma.hbm_to_vmem [thread:$0]  %s3459_s1, 18432, %s29_s13, [#allocation6], %s3348_s22, %s3348_s22, %s3349_s23  }
  0x13   :  { %s3350_s26 = smov [#allocation2]   ;;  %s3275_s30 = scalar_lea.hbm %s3458_s0, 1536 }
  0x14   :  { %s16_s27 = sshll.u32 %s3350_s26, 4  ;;  %p3276_p8 = scmp.ne.s32.totalorder %s3458_s0, %s3275_s30  ;;  %s17_s27 = int_to_ptr.vmem [resolvable:$true] %s16_s27 }
  0x15   :  { %p3279_p9 = scmp.lt.u32.totalorder %s3275_s30, %s3458_s0 }
  0x17   :  { %p3281_p10 = pnand %p3279_p9, %p3276_p8 }
  0x19   :  { %3284 = shalt.err (!%p3281_p10)
}
  0x1a   :  { %s3285_s8 = scalar_lea.vmem %s17_s27, 1536  ;;  %p3290_p12 = scmp.lt.s32.totalorder %s17_s27, %s17_s27 }
  0x1b   :  { %p3286_p11 = scmp.ne.s32.totalorder %s17_s27, %s3285_s8  ;;  %p3291_p13 = scmp.lt.s32.totalorder %s3285_s8, %s3285_s8 }
  0x1d   :  { %p3292_p0 = por %p3291_p13, %p3290_p12 }
  0x1f   :  { %p3293_p1 = pnand %p3292_p0, %p3286_p11 }
  0x21   :  { %3296 = shalt.err (!%p3293_p1)
}
  0x22   :  { %s3351_s1 = smov 768   ;;  %s3352_s9 = smov 48  }
  0x23   :  { %22 = dma.hbm_to_vmem [thread:$0]  %s3458_s0, 1536, %s17_s27, [#allocation3], %s3351_s1, %s3351_s1, %s3352_s9  }
  0x24   :  { %s3353_s12 = smov [#allocation7]   ;;  %s3297_s16 = scalar_lea.hbm %s3460_s2, 18432 }
  0x25   :  { %s40_s13 = sshll.u32 %s3353_s12, 4  ;;  %p3298_p2 = scmp.ne.s32.totalorder %s3460_s2, %s3297_s16  ;;  %s41_s13 = int_to_ptr.vmem [resolvable:$true] %s40_s13 }
  0x26   :  { %p3301_p3 = scmp.lt.u32.totalorder %s3297_s16, %s3460_s2 }
  0x28   :  { %p3303_p4 = pnand %p3301_p3, %p3298_p2 }
  0x2a   :  { %3306 = shalt.err (!%p3303_p4)
}
  0x2b   :  { %s3307_s21 = scalar_lea.vmem %s41_s13, 18432  ;;  %p3312_p6 = scmp.lt.s32.totalorder %s41_s13, %s41_s13 }
  0x2c   :  { %p3308_p5 = scmp.ne.s32.totalorder %s41_s13, %s3307_s21  ;;  %p3313_p7 = scmp.lt.s32.totalorder %s3307_s21, %s3307_s21 }
  0x2e   :  { %p3314_p8 = por %p3313_p7, %p3312_p6 }
  0x30   :  { %p3315_p9 = pnand %p3314_p8, %p3308_p5 }
  0x32   :  { %3318 = shalt.err (!%p3315_p9)
}
  0x33   :  { %s3354_s0 = smov 384   ;;  %s3355_s22 = smov 24  }
  0x34   :  { %46 = dma.hbm_to_vmem [thread:$0]  %s3460_s2, 18432, %s41_s13, [#allocation6], %s3354_s0, %s3354_s0, %s3355_s22  }
  0x35   :  { %3341 = dma.done.wait [#allocation3], 1536  }
  0x36   :  { %3342 = vsyncadd [#allocation3], 4294965760 }
  0x37   :  { %3343 = dma.done.wait [#allocation6], 36864  }
  0x38   :  { %3344 = vsyncadd [#allocation6], 4294930432  ;;  %v2845_v0 = vld [vmem:[#allocation5 + $0x4] ss:$12 sps:$4 sm:$0xff]   ;;  %v2847_v1 = vld [vmem:[#allocation5] ss:$12 sps:$4 sm:$0xff]  }
  0x39   :  { %1035 = vmatprep.subr.bf16.mxu0 %v2845_v0  ;;  %v2848_v2 = vld [vmem:[#allocation5 + $0x1c] ss:$12 sps:$4 sm:$0xff]   ;;  %v2850_v3 = vld [vmem:[#allocation5 + $0x18] ss:$12 sps:$4 sm:$0xff]   ;;  %v2851_v4 = vld [vmem:[#allocation5 + $0x34] ss:$12 sps:$4 sm:$0xff]  }
  0x3a   :  { %1036 = vmatpush1.bf16.msra.mxu0 %v2847_v1  ;;  %v2853_v5 = vld [vmem:[#allocation5 + $0x30] ss:$12 sps:$4 sm:$0xff]   ;;  %v2854_v6 = vld [vmem:[#allocation5 + $0x4c] ss:$12 sps:$4 sm:$0xff]   ;;  %v2856_v7 = vld [vmem:[#allocation5 + $0x48] ss:$12 sps:$4 sm:$0xff]  }
  0x3b   :  { %1037 = vmatprep.subr.bf16.mxu0 %v2848_v2  ;;  %v2857_v8 = vld [vmem:[#allocation5 + $0x64] ss:$12 sps:$4 sm:$0xff]   ;;  %v2859_v9 = vld [vmem:[#allocation5 + $0x60] ss:$12 sps:$4 sm:$0xff]   ;;  %v2860_v10 = vld [vmem:[#allocation5 + $0x7c] ss:$12 sps:$4 sm:$0xff]  }
  0x3c   :  { %v2862_v11 = vld [vmem:[#allocation5 + $0x78] ss:$12 sps:$4 sm:$0xff]   ;;  %v2863_v12 = vld [vmem:[#allocation5 + $0x94] ss:$12 sps:$4 sm:$0xff]   ;;  %v2865_v13 = vld [vmem:[#allocation5 + $0x90] ss:$12 sps:$4 sm:$0xff]  }
  0x3d   :  { %v2893_v14 = vld [vmem:[#allocation5 + $0xc8] ss:$12 sps:$4 sm:$0xff]   ;;  %v64_v17 = vld [vmem:[#allocation2 + $0x38] sm:$0xff]  ;;  %v2898_v21 = vld [vmem:[#allocation5 + $0xe0] ss:$12 sps:$4 sm:$0xff]   ;;  %s3357_s2 = smov [#allocation8]  }
  0x3e   :  { %1038 = vmatpush1.bf16.msra.mxu0 %v2850_v3  ;;  %v2894_v15 = vld [vmem:[#allocation5 + $0x8] ss:$12 sps:$4 sm:$0xff]   ;;  %v2866_v18 = vld [vmem:[#allocation5 + $0xac] ss:$12 sps:$4 sm:$0xff]   ;;  %2748 = vmatprep.subr.bf16.mxu1 %v2893_v14  ;;  %v2869_v23 = vld [vmem:[#allocation5 + $0xc4] ss:$12 sps:$4 sm:$0xff]  }
  0x3f   :  { %1039 = vmatprep.subr.bf16.mxu0 %v2851_v4  ;;  %v58_v16 = vld [vmem:[#allocation2 + $0x8] sm:$0xff]  ;;  %2749 = vmatpush3.bf16.msra.mxu1 %v2894_v15  ;;  %v2903_v25 = vld [vmem:[#allocation5 + $0xf8] ss:$12 sps:$4 sm:$0xff]   ;;  %v2908_v28 = vld [vmem:[#allocation5 + $0x110] ss:$12 sps:$4 sm:$0xff]   ;;  %s2447_s25 = sshll.u32 %s3357_s2, 4  ;;  %s2448_s25 = int_to_ptr.vmem [resolvable:$true] %s2447_s25 }
  0x40   :  { %v70_v19 = vpack.c.bf16 %v64_v17, %v58_v16  ;;  %v2868_v20 = vld [vmem:[#allocation5 + $0xa8] ss:$12 sps:$4 sm:$0xff]   ;;  %v2899_v22 = vld [vmem:[#allocation5 + $0x20] ss:$12 sps:$4 sm:$0xff]   ;;  %2750 = vmatprep.subr.bf16.mxu1 %v2898_v21  ;;  %v2904_v26 = vld [vmem:[#allocation5 + $0x38] ss:$12 sps:$4 sm:$0xff]   ;;  %p3324_p11 = scmp.lt.s32.totalorder %s2448_s25, %s2448_s25 }
  0x41   :  { %v2871_v24 = vld [vmem:[#allocation5 + $0xc0] ss:$12 sps:$4 sm:$0xff]   ;;  %v2872_v27 = vld [vmem:[#allocation5 + $0xdc] ss:$12 sps:$4 sm:$0xff]   ;;  %v2874_v30 = vld [vmem:[#allocation5 + $0xd8] ss:$12 sps:$4 sm:$0xff]  }
  0x42   :  { %1040 = vmatpush1.bf16.msra.mxu0 %v2853_v5  ;;  %1067 = vmatprep.mubr.bf16.mxu0 %v70_v19  ;;  %v2909_v29 = vld [vmem:[#allocation5 + $0x50] ss:$12 sps:$4 sm:$0xff]   ;;  %v2875_v31 = vld [vmem:[#allocation5 + $0xf4] ss:$12 sps:$4 sm:$0xff]   ;;  %v2878_v35 = vld [vmem:[#allocation5 + $0x10c] ss:$12 sps:$4 sm:$0xff]  }
  0x43   :  { %1041 = vmatprep.subr.bf16.mxu0 %v2854_v6  ;;  %1196 = vmatprep.mubr.bf16.mxu1 %v70_v19  ;;  %v2913_v32 = vld [vmem:[#allocation5 + $0x128] ss:$12 sps:$4 sm:$0xff]   ;;  %v2877_v34 = vld [vmem:[#allocation5 + $0xf0] ss:$12 sps:$4 sm:$0xff]   ;;  %v2918_v36 = vld [vmem:[#allocation5 + $0x140] ss:$12 sps:$4 sm:$0xff]  }
  0x44   :  { %2751 = vmatpush3.bf16.msra.mxu1 %v2899_v22  ;;  %v2914_v33 = vld [vmem:[#allocation5 + $0x68] ss:$12 sps:$4 sm:$0xff]   ;;  %v2919_v37 = vld [vmem:[#allocation5 + $0x80] ss:$12 sps:$4 sm:$0xff]   ;;  %v2923_v39 = vld [vmem:[#allocation5 + $0x158] ss:$12 sps:$4 sm:$0xff]  }
  0x45   :  { %2752 = vmatprep.subr.bf16.mxu1 %v2903_v25  ;;  %v2880_v38 = vld [vmem:[#allocation5 + $0x108] ss:$12 sps:$4 sm:$0xff]   ;;  %v2881_v40 = vld [vmem:[#allocation5 + $0x124] ss:$12 sps:$4 sm:$0xff]   ;;  %v2883_v43 = vld [vmem:[#allocation5 + $0x120] ss:$12 sps:$4 sm:$0xff]  }
  0x46   :  { %1042 = vmatpush1.bf16.msra.mxu0 %v2856_v7  ;;  %v2924_v41 = vld [vmem:[#allocation5 + $0x98] ss:$12 sps:$4 sm:$0xff]   ;;  %v2928_v42 = vld [vmem:[#allocation5 + $0x170] ss:$12 sps:$4 sm:$0xff]   ;;  %v2933_v48 = vld [vmem:[#allocation5 + $0x248] ss:$12 sps:$4 sm:$0xff]  }
  0x47   :  { %1043 = vmatprep.subr.bf16.mxu0 %v2857_v8  ;;  %v2884_v44 = vld [vmem:[#allocation5 + $0x13c] ss:$12 sps:$4 sm:$0xff]   ;;  %v2886_v45 = vld [vmem:[#allocation5 + $0x138] ss:$12 sps:$4 sm:$0xff]   ;;  %v63_v49 = vld [vmem:[#allocation2 + $0x30] sm:$0xff]  ;;  %s3319_s26 = scalar_lea.vmem %s2448_s25, 1536 }
  0x48   :  { %2753 = vmatpush3.bf16.msra.mxu1 %v2904_v26  ;;  %v57_v46 = vld [vmem:[#allocation2] sm:$0xff]  ;;  %v2929_v47 = vld [vmem:[#allocation5 + $0xb0] ss:$12 sps:$4 sm:$0xff]   ;;  %v2934_v51 = vld [vmem:[#allocation5 + $0x188] ss:$12 sps:$4 sm:$0xff]   ;;  %p3320_p10 = scmp.ne.s32.totalorder %s2448_s25, %s3319_s26  ;;  %p3325_p12 = scmp.lt.s32.totalorder %s3319_s26, %s3319_s26 }
  0x49   :  { %2754 = vmatprep.subr.bf16.mxu1 %v2908_v28  ;;  %v2887_v50 = vld [vmem:[#allocation5 + $0x154] ss:$12 sps:$4 sm:$0xff]   ;;  %v69_v52 = vpack.c.bf16 %v63_v49, %v57_v46  ;;  %v2889_v54 = vld [vmem:[#allocation5 + $0x150] ss:$12 sps:$4 sm:$0xff]   ;;  %v2890_v55 = vld [vmem:[#allocation5 + $0x16c] ss:$12 sps:$4 sm:$0xff]  }
  0x4a   :  { %1044 = vmatpush1.bf16.msra.mxu0 %v2859_v9  ;;  %v2938_v53 = vld [vmem:[#allocation5 + $0x260] ss:$12 sps:$4 sm:$0xff]   ;;  %v2943_v57 = vld [vmem:[#allocation5 + $0x278] ss:$12 sps:$4 sm:$0xff]   ;;  %v2892_v58 = vld [vmem:[#allocation5 + $0x168] ss:$12 sps:$4 sm:$0xff]   ;;  %p3326_p13 = por %p3325_p12, %p3324_p11 }
  0x4b   :  { %1045 = vmatprep.subr.bf16.mxu0 %v2860_v10  ;;  %v2939_v56 = vld [vmem:[#allocation5 + $0x1a0] ss:$12 sps:$4 sm:$0xff]   ;;  %v2897_v59 = vld [vmem:[#allocation5 + $0x184] ss:$12 sps:$4 sm:$0xff]   ;;  %v2902_v63 = vld [vmem:[#allocation5 + $0x19c] ss:$12 sps:$4 sm:$0xff]  }
  0x4c   :  { %2755 = vmatpush3.bf16.msra.mxu1 %v2909_v29  ;;  %v2944_v60 = vld [vmem:[#allocation5 + $0x1b8] ss:$12 sps:$4 sm:$0xff]   ;;  %v2948_v61 = vld [vmem:[#allocation5 + $0x290] ss:$12 sps:$4 sm:$0xff]   ;;  %v2895_v62 = vld [vmem:[#allocation5 + $0x180] ss:$12 sps:$4 sm:$0xff]   ;;  %p3327_p0 = pnand %p3326_p13, %p3320_p10 }
  0x4d   :  { %2756 = vmatprep.subr.bf16.mxu1 %v2913_v32  ;;  %v2949_v0 = vld [vmem:[#allocation5 + $0x1d0] ss:$12 sps:$4 sm:$0xff]   ;;  %v2953_v1 = vld [vmem:[#allocation5 + $0x2a8] ss:$12 sps:$4 sm:$0xff]   ;;  %v2900_v2 = vld [vmem:[#allocation5 + $0x198] ss:$12 sps:$4 sm:$0xff]  }
  0x4e   :  { %1046 = vmatpush1.bf16.msra.mxu0 %v2862_v11  ;;  %v2907_v3 = vld [vmem:[#allocation5 + $0x1b4] ss:$12 sps:$4 sm:$0xff]   ;;  %v2905_v6 = vld [vmem:[#allocation5 + $0x1b0] ss:$12 sps:$4 sm:$0xff]   ;;  %v2912_v7 = vld [vmem:[#allocation5 + $0x1cc] ss:$12 sps:$4 sm:$0xff]  }
  0x4f   :  { %1047 = vmatprep.subr.bf16.mxu0 %v2863_v12  ;;  %v2954_v4 = vld [vmem:[#allocation5 + $0x1e8] ss:$12 sps:$4 sm:$0xff]   ;;  %v2958_v5 = vld [vmem:[#allocation5 + $0x2c0] ss:$12 sps:$4 sm:$0xff]   ;;  %v2963_v9 = vld [vmem:[#allocation5 + $0x2d8] ss:$12 sps:$4 sm:$0xff]  }
  0x50   :  { %2757 = vmatpush3.bf16.msra.mxu1 %v2914_v33  ;;  %v2959_v8 = vld [vmem:[#allocation5 + $0x200] ss:$12 sps:$4 sm:$0xff]   ;;  %v2910_v10 = vld [vmem:[#allocation5 + $0x1c8] ss:$12 sps:$4 sm:$0xff]   ;;  %v2917_v11 = vld [vmem:[#allocation5 + $0x1e4] ss:$12 sps:$4 sm:$0xff]  }
  0x51   :  { %2758 = vmatprep.subr.bf16.mxu1 %v2918_v36  ;;  %v60_v12 = vld [vmem:[#allocation2 + $0x18] sm:$0xff]  ;;  %v2915_v14 = vld [vmem:[#allocation5 + $0x1e0] ss:$12 sps:$4 sm:$0xff]   ;;  %v2973_v22 = vld [vmem:[#allocation5 + $0x3c8] ss:$12 sps:$4 sm:$0xff]  }
  0x52   :  { %1048 = vmatpush1.bf16.msra.mxu0 %v2865_v13  ;;  %v66_v13 = vld [vmem:[#allocation2 + $0x48] sm:$0xff]  ;;  %v2964_v15 = vld [vmem:[#allocation5 + $0x218] ss:$12 sps:$4 sm:$0xff]   ;;  %v2968_v17 = vld [vmem:[#allocation5 + $0x2f0] ss:$12 sps:$4 sm:$0xff]  }
  0x53   :  { %1049 = vmatprep.subr.bf16.mxu0 %v2866_v18  ;;  %v72_v16 = vpack.c.bf16 %v66_v13, %v60_v12  ;;  %v2922_v18 = vld [vmem:[#allocation5 + $0x1fc] ss:$12 sps:$4 sm:$0xff]   ;;  %v65_v21 = vld [vmem:[#allocation2 + $0x40] sm:$0xff]  ;;  %v2932_v29 = vld [vmem:[#allocation5 + $0x22c] ss:$12 sps:$4 sm:$0xff]  }
  0x54   :  { %2759 = vmatpush3.bf16.msra.mxu1 %v2919_v37  ;;  %v2969_v19 = vld [vmem:[#allocation5 + $0x230] ss:$12 sps:$4 sm:$0xff]   ;;  %v2974_v26 = vld [vmem:[#allocation5 + $0x308] ss:$12 sps:$4 sm:$0xff]   ;;  %v2935_v36 = vld [vmem:[#allocation5 + $0x240] ss:$12 sps:$4 sm:$0xff]  }
  0x55   :  { %2760 = vmatprep.subr.bf16.mxu1 %v2923_v39  ;;  %v2925_v28 = vld [vmem:[#allocation5 + $0x210] ss:$12 sps:$4 sm:$0xff]   ;;  %v2930_v32 = vld [vmem:[#allocation5 + $0x228] ss:$12 sps:$4 sm:$0xff]   ;;  %v2980_v13 = vld [vmem:[#allocation5 + $0x318] ss:$12 sps:$4 sm:$0xff]  }
  0x56   :  { %1050 = vmatpush1.bf16.msra.mxu0 %v2868_v20  ;;  %v59_v20 = vld [vmem:[#allocation2 + $0x10] sm:$0xff]  ;;  %v2942_v37 = vld [vmem:[#allocation5 + $0x25c] ss:$12 sps:$4 sm:$0xff]  }
  0x57   :  { %1051 = vmatprep.subr.bf16.mxu0 %v2869_v23  ;;  %v2920_v23 = vld [vmem:[#allocation5 + $0x1f8] ss:$12 sps:$4 sm:$0xff]   ;;  %v3417_v25 = vpack.c.bf16 %v65_v21, %v59_v20  ;;  %v2993_v39 = vld [vmem:[#allocation5 + $0x428] ss:$12 sps:$4 sm:$0xff]  }
  0x58   :  { %2761 = vmatpush3.bf16.msra.mxu1 %v2924_v41  ;;  %v2937_v33 = vld [vmem:[#allocation5 + $0x244] ss:$12 sps:$4 sm:$0xff]   ;;  %v2947_v41 = vld [vmem:[#allocation5 + $0x274] ss:$12 sps:$4 sm:$0xff]   ;;  %v62_v46 = vld [vmem:[#allocation2 + $0x28] sm:$0xff] }
  0x59   :  { %2762 = vmatprep.subr.bf16.mxu1 %v2928_v42  ;;  %v2994_v42 = vld [vmem:[#allocation5 + $0x368] ss:$12 sps:$4 sm:$0xff]   ;;  %v3061_v20 = vld [vmem:[#allocation7 + $0xc0] ss:$24 sps:$4 sm:$0xff]   ;;  %v3063_v21 = vld [vmem:[#allocation7 + $0xc4] ss:$24 sps:$4 sm:$0xff]  }
  0x5a   :  { %1052 = vmatpush1.bf16.msra.mxu0 %v2871_v24  ;;  %v2927_v24 = vld [vmem:[#allocation5 + $0x214] ss:$12 sps:$4 sm:$0xff]   ;;  %v3055_v12 = vld [vmem:[#allocation7 + $0x90] ss:$24 sps:$4 sm:$0xff]  }
  0x5b   :  { %1053 = vmatprep.subr.bf16.mxu0 %v2872_v27  ;;  %v2978_v27 = vld [vmem:[#allocation5 + $0x3e0] ss:$12 sps:$4 sm:$0xff]  }
  0x5c   :  { %2763 = vmatpush3.bf16.msra.mxu1 %v2929_v47  ;;  %v68_v47 = vld [vmem:[#allocation2 + $0x58] sm:$0xff] }
  0x5d   :  { %2770 = vmatprep.subr.bf16.mxu1 %v2933_v48  ;;  %v2999_v48 = vld [vmem:[#allocation5 + $0x380] ss:$12 sps:$4 sm:$0xff]   ;;  %v74_v49 = vpack.c.bf16 %v68_v47, %v62_v46 }
  0x5e   :  { %1054 = vmatpush1.bf16.msra.mxu0 %v2874_v30  ;;  %v2979_v30 = vld [vmem:[#allocation5 + $0x320] ss:$12 sps:$4 sm:$0xff]  }
  0x5f   :  { %1055 = vmatprep.subr.bf16.mxu0 %v2875_v31  ;;  %1197 = vmatmul.mubr.bf16.vlgmr.msra.gmra.mrb[0].mxu1 %v69_v52  ;;  %v2983_v31 = vld [vmem:[#allocation5 + $0x3f8] ss:$12 sps:$4 sm:$0xff]   ;;  %v3040_v47 = vld [vmem:[#allocation7 + $0x8] ss:$24 sps:$4 sm:$0xff]  }
  0x60   :  { %2771 = vmatpush3.bf16.msra.mxu1 %v2934_v51  ;;  %1237 = vmatprep.mubr.bf16.mxu1 %v72_v16  ;;  %v2950_v51 = vld [vmem:[#allocation5 + $0x288] ss:$12 sps:$4 sm:$0xff]   ;;  %v3042_v46 = vld [vmem:[#allocation7 + $0xc] ss:$24 sps:$4 sm:$0xff]  }
  0x61   :  { %2772 = vmatprep.subr.bf16.mxu1 %v2938_v53  ;;  %v3004_v53 = vld [vmem:[#allocation5 + $0x398] ss:$12 sps:$4 sm:$0xff]  }
  0x62   :  { %1056 = vmatpush1.bf16.msra.mxu0 %v2877_v34  ;;  %v2984_v34 = vld [vmem:[#allocation5 + $0x338] ss:$12 sps:$4 sm:$0xff]  }
  0x63   :  { %1057 = vmatprep.subr.bf16.mxu0 %v2878_v35  ;;  %v2988_v35 = vld [vmem:[#allocation5 + $0x410] ss:$12 sps:$4 sm:$0xff]  }
  0x64   :  { %2773 = vmatpush3.bf16.msra.mxu1 %v2939_v56  ;;  %v2962_v56 = vld [vmem:[#allocation5 + $0x2bc] ss:$12 sps:$4 sm:$0xff]  }
  0x65   :  { %2774 = vmatprep.subr.bf16.mxu1 %v2943_v57  ;;  %v3009_v57 = vld [vmem:[#allocation5 + $0x3b0] ss:$12 sps:$4 sm:$0xff]  }
  0x66   :  { %1058 = vmatpush1.bf16.msra.mxu0 %v2880_v38  ;;  %v2989_v38 = vld [vmem:[#allocation5 + $0x350] ss:$12 sps:$4 sm:$0xff]  }
  0x67   :  { %1059 = vmatprep.subr.bf16.mxu0 %v2881_v40  ;;  %v2940_v40 = vld [vmem:[#allocation5 + $0x258] ss:$12 sps:$4 sm:$0xff]  }
  0x68   :  { %2775 = vmatpush3.bf16.msra.mxu1 %v2944_v60  ;;  %v2960_v60 = vld [vmem:[#allocation5 + $0x2b8] ss:$12 sps:$4 sm:$0xff]  }
  0x69   :  { %2776 = vmatprep.subr.bf16.mxu1 %v2948_v61  ;;  %v2967_v61 = vld [vmem:[#allocation5 + $0x2d4] ss:$12 sps:$4 sm:$0xff]  }
  0x6a   :  { %1060 = vmatpush1.bf16.msra.mxu0 %v2883_v43  ;;  %v2998_v43 = vld [vmem:[#allocation5 + $0x440] ss:$12 sps:$4 sm:$0xff]  }
  0x6b   :  { %1061 = vmatprep.subr.bf16.mxu0 %v2884_v44  ;;  %v2945_v44 = vld [vmem:[#allocation5 + $0x270] ss:$12 sps:$4 sm:$0xff]  }
  0x6c   :  { %2777 = vmatpush3.bf16.msra.mxu1 %v2949_v0  ;;  %v3039_v0 = vld [vmem:[#allocation7 + $0x4] ss:$24 sps:$4 sm:$0xff]  }
  0x6d   :  { %2778 = vmatprep.subr.bf16.mxu1 %v2953_v1  ;;  %v2965_v1 = vld [vmem:[#allocation5 + $0x2d0] ss:$12 sps:$4 sm:$0xff]  }
  0x6e   :  { %1062 = vmatpush1.bf16.msra.mxu0 %v2886_v45  ;;  %v2952_v45 = vld [vmem:[#allocation5 + $0x28c] ss:$12 sps:$4 sm:$0xff]  }
  0x6f   :  { %1063 = vmatprep.subr.bf16.mxu0 %v2887_v50  ;;  %v3003_v50 = vld [vmem:[#allocation5 + $0x458] ss:$12 sps:$4 sm:$0xff]  }
  0x70   :  { %2779 = vmatpush3.bf16.msra.mxu1 %v2954_v4  ;;  %v3043_v4 = vld [vmem:[#allocation7 + $0x30] ss:$24 sps:$4 sm:$0xff]  }
  0x71   :  { %2780 = vmatprep.subr.bf16.mxu1 %v2958_v5  ;;  %v3051_v5 = vld [vmem:[#allocation7 + $0x64] ss:$24 sps:$4 sm:$0xff]  }
  0x72   :  { %1064 = vmatpush1.bf16.msra.mxu0 %v2889_v54  ;;  %v2955_v54 = vld [vmem:[#allocation5 + $0x2a0] ss:$12 sps:$4 sm:$0xff]  }
  0x73   :  { %1065 = vmatprep.subr.bf16.mxu0 %v2890_v55  ;;  %v3008_v55 = vld [vmem:[#allocation5 + $0x470] ss:$12 sps:$4 sm:$0xff]  }
  0x74   :  { %2781 = vmatpush3.bf16.msra.mxu1 %v2959_v8  ;;  %v2975_v8 = vld [vmem:[#allocation5 + $0x300] ss:$12 sps:$4 sm:$0xff]  }
  0x75   :  { %2782 = vmatprep.subr.bf16.mxu1 %v2963_v9  ;;  %v3049_v9 = vld [vmem:[#allocation7 + $0x60] ss:$24 sps:$4 sm:$0xff]  }
  0x76   :  { %1066 = vmatpush1.bf16.msra.mxu0 %v2892_v58  ;;  %v61_v58 = vld [vmem:[#allocation2 + $0x20] sm:$0xff] }
  0x77   :  { %1078 = vmatprep.subr.bf16.mxu0 %v2897_v59  ;;  %v67_v59 = vld [vmem:[#allocation2 + $0x50] sm:$0xff] }
  0x78   :  { %2783 = vmatpush3.bf16.msra.mxu1 %v2964_v15  ;;  %v2985_v15 = vld [vmem:[#allocation5 + $0x330] ss:$12 sps:$4 sm:$0xff]  }
  0x79   :  { %1068 = vmatmul.mubr.bf16.vlgmr.msra.gmra.mrb[0].mxu0 %v69_v52  ;;  %2784 = vmatprep.subr.bf16.mxu1 %v2968_v17  ;;  %v2957_v52 = vld [vmem:[#allocation5 + $0x2a4] ss:$12 sps:$4 sm:$0xff]   ;;  %v2990_v17 = vld [vmem:[#allocation5 + $0x348] ss:$12 sps:$4 sm:$0xff]  }
  0x7a   :  { %1079 = vmatpush1.bf16.msra.mxu0 %v2895_v62  ;;  %1110 = vmatprep.mubr.bf16.mxu0 %v72_v16  ;;  %v3420_v62 = vpack.c.bf16 %v67_v59, %v61_v58  ;;  %v2992_v16 = vld [vmem:[#allocation5 + $0x34c] ss:$12 sps:$4 sm:$0xff]   ;;  %v3075_v59 = vld [vmem:[#allocation7 + $0x124] ss:$24 sps:$4 sm:$0xff]  }
  0x7b   :  { %1080 = vmatprep.subr.bf16.mxu0 %v2902_v63  ;;  %v3037_v63 = vld [vmem:[#allocation7] ss:$24 sps:$4 sm:$0xff]  }
  0x7c   :  { %2785 = vmatpush3.bf16.msra.mxu1 %v2969_v19  ;;  %v2995_v19 = vld [vmem:[#allocation5 + $0x360] ss:$12 sps:$4 sm:$0xff]  }
  0x7d   :  { %2792 = vmatprep.subr.bf16.mxu1 %v2973_v22  ;;  %v3002_v22 = vld [vmem:[#allocation5 + $0x37c] ss:$12 sps:$4 sm:$0xff]   ;;  %v3073_v58 = vld [vmem:[#allocation7 + $0x120] ss:$24 sps:$4 sm:$0xff]  }
  0x7e   :  { %1081 = vmatpush1.bf16.msra.mxu0 %v2900_v2  ;;  %v3045_v2 = vld [vmem:[#allocation7 + $0x34] ss:$24 sps:$4 sm:$0xff]  }
  0x7f   :  { %1082 = vmatprep.subr.bf16.mxu0 %v2907_v3  ;;  %1238 = vmatmul.mubr.bf16.vlgmr.msra.gmra.mrb[4].mxu1 %v3417_v25  ;;  %v2972_v3 = vld [vmem:[#allocation5 + $0x2ec] ss:$12 sps:$4 sm:$0xff]  }
  0x80   :  { %2793 = vmatpush3.bf16.msra.mxu1 %v2974_v26  ;;  %1278 = vmatprep.mubr.bf16.mxu1 %v74_v49  ;;  %v3012_v26 = vld [vmem:[#allocation5 + $0x3ac] ss:$12 sps:$4 sm:$0xff]  }
  0x81   :  { %2794 = vmatprep.subr.bf16.mxu1 %v2978_v27  ;;  %v3010_v27 = vld [vmem:[#allocation5 + $0x3a8] ss:$12 sps:$4 sm:$0xff]  }
  0x82   :  { %1083 = vmatpush1.bf16.msra.mxu0 %v2905_v6  ;;  %v2970_v6 = vld [vmem:[#allocation5 + $0x2e8] ss:$12 sps:$4 sm:$0xff]  }
  0x83   :  { %1084 = vmatprep.subr.bf16.mxu0 %v2912_v7  ;;  %v2977_v7 = vld [vmem:[#allocation5 + $0x304] ss:$12 sps:$4 sm:$0xff]  }
  0x84   :  { %2795 = vmatpush3.bf16.msra.mxu1 %v2979_v30  ;;  %v3018_v30 = vld [vmem:[#allocation5 + $0x3dc] ss:$12 sps:$4 sm:$0xff]  }
  0x85   :  { %2796 = vmatprep.subr.bf16.mxu1 %v2983_v31  ;;  %v3016_v31 = vld [vmem:[#allocation5 + $0x3d8] ss:$12 sps:$4 sm:$0xff]  }
  0x86   :  { %1085 = vmatpush1.bf16.msra.mxu0 %v2910_v10  ;;  %v2982_v10 = vld [vmem:[#allocation5 + $0x31c] ss:$12 sps:$4 sm:$0xff]  }
  0x87   :  { %1086 = vmatprep.subr.bf16.mxu0 %v2917_v11  ;;  %v3057_v11 = vld [vmem:[#allocation7 + $0x94] ss:$24 sps:$4 sm:$0xff]  }
  0x88   :  { %2797 = vmatpush3.bf16.msra.mxu1 %v2984_v34  ;;  %v3024_v34 = vld [vmem:[#allocation5 + $0x40c] ss:$12 sps:$4 sm:$0xff]  }
  0x89   :  { %2798 = vmatprep.subr.bf16.mxu1 %v2988_v35  ;;  %v3022_v35 = vld [vmem:[#allocation5 + $0x408] ss:$12 sps:$4 sm:$0xff]  }
  0x8a   :  { %1087 = vmatpush1.bf16.msra.mxu0 %v2915_v14  ;;  %v2987_v14 = vld [vmem:[#allocation5 + $0x334] ss:$12 sps:$4 sm:$0xff]  }
  0x8b   :  { %1088 = vmatprep.subr.bf16.mxu0 %v2922_v18  ;;  %v2997_v18 = vld [vmem:[#allocation5 + $0x364] ss:$12 sps:$4 sm:$0xff]  }
  0x8c   :  { %2799 = vmatpush3.bf16.msra.mxu1 %v2989_v38  ;;  %v3030_v38 = vld [vmem:[#allocation5 + $0x43c] ss:$12 sps:$4 sm:$0xff]  }
  0x8d   :  { %2800 = vmatprep.subr.bf16.mxu1 %v2993_v39  ;;  %v3067_v39 = vld [vmem:[#allocation7 + $0xf0] ss:$24 sps:$4 sm:$0xff]  }
  0x8e   :  { %1089 = vmatpush1.bf16.msra.mxu0 %v2920_v23  ;;  %v3000_v23 = vld [vmem:[#allocation5 + $0x378] ss:$12 sps:$4 sm:$0xff]  }
  0x8f   :  { %1090 = vmatprep.subr.bf16.mxu0 %v2927_v24  ;;  %v3007_v24 = vld [vmem:[#allocation5 + $0x394] ss:$12 sps:$4 sm:$0xff]  }
  0x90   :  { %2801 = vmatpush3.bf16.msra.mxu1 %v2994_v42  ;;  %v3033_v42 = vld [vmem:[#allocation5 + $0x454] ss:$12 sps:$4 sm:$0xff]  }
  0x91   :  { %2802 = vmatprep.subr.bf16.mxu1 %v2998_v43  ;;  %v3031_v43 = vld [vmem:[#allocation5 + $0x450] ss:$12 sps:$4 sm:$0xff]  }
  0x92   :  { %1091 = vmatpush1.bf16.msra.mxu0 %v2925_v28  ;;  %v3015_v28 = vld [vmem:[#allocation5 + $0x3c4] ss:$12 sps:$4 sm:$0xff]  }
  0x93   :  { %1092 = vmatprep.subr.bf16.mxu0 %v2932_v29  ;;  %v3013_v29 = vld [vmem:[#allocation5 + $0x3c0] ss:$12 sps:$4 sm:$0xff]  }
  0x94   :  { %2803 = vmatpush3.bf16.msra.mxu1 %v2999_v48  ;;  %v3048_v48 = vld [vmem:[#allocation7 + $0x3c] ss:$24 sps:$4 sm:$0xff]  }
  0x95   :  { %2804 = vmatprep.subr.bf16.mxu1 %v3003_v50  ;;  %v3054_v50 = vld [vmem:[#allocation7 + $0x6c] ss:$24 sps:$4 sm:$0xff]  }
  0x96   :  { %1093 = vmatpush1.bf16.msra.mxu0 %v2930_v32  ;;  %v3021_v32 = vld [vmem:[#allocation5 + $0x3f4] ss:$12 sps:$4 sm:$0xff]  }
  0x97   :  { %1094 = vmatprep.subr.bf16.mxu0 %v2937_v33  ;;  %v3019_v33 = vld [vmem:[#allocation5 + $0x3f0] ss:$12 sps:$4 sm:$0xff]  }
  0x98   :  { %2805 = vmatpush3.bf16.msra.mxu1 %v3004_v53  ;;  %v3058_v53 = vld [vmem:[#allocation7 + $0x98] ss:$24 sps:$4 sm:$0xff]  }
  0x99   :  { %2806 = vmatprep.subr.bf16.mxu1 %v3008_v55  ;;  %v3064_v55 = vld [vmem:[#allocation7 + $0xc8] ss:$24 sps:$4 sm:$0xff]  }
  0x9a   :  { %1095 = vmatpush1.bf16.msra.mxu0 %v2935_v36  ;;  %v3027_v36 = vld [vmem:[#allocation5 + $0x424] ss:$12 sps:$4 sm:$0xff]  }
  0x9b   :  { %1096 = vmatprep.subr.bf16.mxu0 %v2942_v37  ;;  %v3025_v37 = vld [vmem:[#allocation5 + $0x420] ss:$12 sps:$4 sm:$0xff]  }
  0x9c   :  { %2807 = vmatpush3.bf16.msra.mxu1 %v3009_v57  ;;  %v3070_v57 = vld [vmem:[#allocation7 + $0xf8] ss:$24 sps:$4 sm:$0xff]  }
  0x9d   :  { %2160 = vmatprep.subr.bf16.mxu1 %v3039_v0  ;;  %v3084_v0 = vld [vmem:[#allocation7 + $0x15c] ss:$24 sps:$4 sm:$0xff]  }
  0x9e   :  { %1097 = vmatpush1.bf16.msra.mxu0 %v2940_v40  ;;  %v3069_v40 = vld [vmem:[#allocation7 + $0xf4] ss:$24 sps:$4 sm:$0xff]  }
  0x9f   :  { %1098 = vmatprep.subr.bf16.mxu0 %v2947_v41  ;;  %1279 = vmatmul.mubr.bf16.vlgmr.msra.gmra.mrb[8].mxu1 %v3420_v62  ;;  %v3028_v41 = vld [vmem:[#allocation5 + $0x438] ss:$12 sps:$4 sm:$0xff]  }
  0xa0   :  { %2161 = vmatpush1.bf16.msra.mxu1 %v3037_v63  ;;  %v3079_v63 = vld [vmem:[#allocation7 + $0x150] ss:$24 sps:$4 sm:$0xff]  }
  0xa1   :  { %2162 = vmatprep.subr.bf16.mxu1 %v3045_v2  ;;  %v3082_v2 = vld [vmem:[#allocation7 + $0x158] ss:$24 sps:$4 sm:$0xff]  }
  0xa2   :  { %1099 = vmatpush1.bf16.msra.mxu0 %v2945_v44  ;;  %v3036_v44 = vld [vmem:[#allocation5 + $0x46c] ss:$12 sps:$4 sm:$0xff]  }
  0xa3   :  { %1100 = vmatprep.subr.bf16.mxu0 %v2952_v45  ;;  %v3034_v45 = vld [vmem:[#allocation5 + $0x468] ss:$12 sps:$4 sm:$0xff]  }
  0xa4   :  { %2163 = vmatpush1.bf16.msra.mxu1 %v3043_v4  ;;  %v3090_v4 = vld [vmem:[#allocation7 + $0x18c] ss:$24 sps:$4 sm:$0xff]  }
  0xa5   :  { %2164 = vmatprep.subr.bf16.mxu1 %v3051_v5  ;;  %v3093_v5 = vld [vmem:[#allocation7 + $0x1b4] ss:$24 sps:$4 sm:$0xff]  }
  0xa6   :  { %1101 = vmatpush1.bf16.msra.mxu0 %v2950_v51  ;;  %v3052_v51 = vld [vmem:[#allocation7 + $0x68] ss:$24 sps:$4 sm:$0xff]  }
  0xa7   :  { %1102 = vmatprep.subr.bf16.mxu0 %v2957_v52  ;;  %v3060_v52 = vld [vmem:[#allocation7 + $0x9c] ss:$24 sps:$4 sm:$0xff]  }
  0xa8   :  { %2165 = vmatpush1.bf16.msra.mxu1 %v3049_v9  ;;  %v3099_v9 = vld [vmem:[#allocation7 + $0x1e4] ss:$24 sps:$4 sm:$0xff]  }
  0xa9   :  { %2166 = vmatprep.subr.bf16.mxu1 %v3057_v11  ;;  %v3097_v11 = vld [vmem:[#allocation7 + $0x1e0] ss:$24 sps:$4 sm:$0xff]  }
  0xaa   :  { %1103 = vmatpush1.bf16.msra.mxu0 %v2955_v54  ;;  %v3066_v54 = vld [vmem:[#allocation7 + $0xcc] ss:$24 sps:$4 sm:$0xff]  }
  0xab   :  { %1104 = vmatprep.subr.bf16.mxu0 %v2962_v56  ;;  %v3072_v56 = vld [vmem:[#allocation7 + $0xfc] ss:$24 sps:$4 sm:$0xff]  }
  0xac   :  { %2167 = vmatpush1.bf16.msra.mxu1 %v3055_v12  ;;  %v3102_v12 = vld [vmem:[#allocation7 + $0x1ec] ss:$24 sps:$4 sm:$0xff]  }
  0xad   :  { %2168 = vmatprep.subr.bf16.mxu1 %v3063_v21  ;;  %v3117_v21 = vld [vmem:[#allocation7 + $0x274] ss:$24 sps:$4 sm:$0xff]  }
  0xae   :  { %1105 = vmatpush1.bf16.msra.mxu0 %v2960_v60  ;;  %v3078_v60 = vld [vmem:[#allocation7 + $0x12c] ss:$24 sps:$4 sm:$0xff]  }
  0xaf   :  { %1106 = vmatprep.subr.bf16.mxu0 %v2967_v61  ;;  %v3081_v61 = vld [vmem:[#allocation7 + $0x154] ss:$24 sps:$4 sm:$0xff]  }
  0xb0   :  { %2169 = vmatpush1.bf16.msra.mxu1 %v3061_v20  ;;  %v3114_v20 = vld [vmem:[#allocation7 + $0x24c] ss:$24 sps:$4 sm:$0xff]  }
  0xb1   :  { %2170 = vmatprep.subr.bf16.mxu1 %v3069_v40  ;;  %v3135_v40 = vld [vmem:[#allocation7 + $0x304] ss:$24 sps:$4 sm:$0xff]  }
  0xb2   :  { %1107 = vmatpush1.bf16.msra.mxu0 %v2965_v1  ;;  %v3087_v1 = vld [vmem:[#allocation7 + $0x184] ss:$24 sps:$4 sm:$0xff]  }
  0xb3   :  { %1108 = vmatprep.subr.bf16.mxu0 %v2972_v3  ;;  %v3085_v3 = vld [vmem:[#allocation7 + $0x180] ss:$24 sps:$4 sm:$0xff]  }
  0xb4   :  { %2171 = vmatpush1.bf16.msra.mxu1 %v3067_v39  ;;  %v3130_v39 = vld [vmem:[#allocation7 + $0x2d8] ss:$24 sps:$4 sm:$0xff]  }
  0xb5   :  { %2172 = vmatprep.subr.bf16.mxu1 %v3075_v59 }
  0xb6   :  { %1109 = vmatpush1.bf16.msra.mxu0 %v2970_v6  ;;  %v3088_v6 = vld [vmem:[#allocation7 + $0x188] ss:$24 sps:$4 sm:$0xff]  }
  0xb7   :  { %1121 = vmatprep.subr.bf16.mxu0 %v2977_v7  ;;  %v3091_v7 = vld [vmem:[#allocation7 + $0x1b0] ss:$24 sps:$4 sm:$0xff]  }
  0xb8   :  { %2173 = vmatpush1.bf16.msra.mxu1 %v3073_v58 }
  0xb9   :  { %1111 = vmatmul.mubr.bf16.vlgmr.msra.gmra.mrb[0].mxu0 %v3417_v25  ;;  %v3005_v25 = vld [vmem:[#allocation5 + $0x390] ss:$12 sps:$4 sm:$0xff]   ;;  %2174 = vmatprep.subr.bf16.mxu1 %v3081_v61 }
  0xba   :  { %1122 = vmatpush1.bf16.msra.mxu0 %v2975_v8  ;;  %1153 = vmatprep.mubr.bf16.mxu0 %v74_v49  ;;  %v3046_v49 = vld [vmem:[#allocation7 + $0x38] ss:$24 sps:$4 sm:$0xff]   ;;  %v3096_v8 = vld [vmem:[#allocation7 + $0x1bc] ss:$24 sps:$4 sm:$0xff]  }
  0xbb   :  { %1123 = vmatprep.subr.bf16.mxu0 %v2982_v10  ;;  %v3094_v10 = vld [vmem:[#allocation7 + $0x1b8] ss:$24 sps:$4 sm:$0xff]  }
  0xbc   :  { %2175 = vmatpush1.bf16.msra.mxu1 %v3079_v63 }
  0xbd   :  { %2176 = vmatprep.subr.bf16.mxu1 %v3087_v1 }
  0xbe   :  { %1124 = vmatpush1.bf16.msra.mxu0 %v2980_v13  ;;  %v3105_v13 = vld [vmem:[#allocation7 + $0x214] ss:$24 sps:$4 sm:$0xff]  }
  0xbf   :  { %1125 = vmatprep.subr.bf16.mxu0 %v2987_v14  ;;  %v3100_v14 = vld [vmem:[#allocation7 + $0x1e8] ss:$24 sps:$4 sm:$0xff]  }
  0xc0   :  { %2177 = vmatpush1.bf16.msra.mxu1 %v3085_v3 }
  0xc1   :  { %2178 = vmatprep.subr.bf16.mxu1 %v3093_v5 }
  0xc2   :  { %1126 = vmatpush1.bf16.msra.mxu0 %v2985_v15  ;;  %v3103_v15 = vld [vmem:[#allocation7 + $0x210] ss:$24 sps:$4 sm:$0xff]  }
  0xc3   :  { %1127 = vmatprep.subr.bf16.mxu0 %v2992_v16  ;;  %v3108_v16 = vld [vmem:[#allocation7 + $0x21c] ss:$24 sps:$4 sm:$0xff]  }
  0xc4   :  { %2179 = vmatpush1.bf16.msra.mxu1 %v3091_v7  ;;  %v3133_v7 = vld [vmem:[#allocation7 + $0x300] ss:$24 sps:$4 sm:$0xff]  }
  0xc5   :  { %2180 = vmatprep.subr.bf16.mxu1 %v3099_v9  ;;  %v3141_v9 = vld [vmem:[#allocation7 + $0x334] ss:$24 sps:$4 sm:$0xff]  }
  0xc6   :  { %1128 = vmatpush1.bf16.msra.mxu0 %v2990_v17  ;;  %v3111_v17 = vld [vmem:[#allocation7 + $0x244] ss:$24 sps:$4 sm:$0xff]  }
  0xc7   :  { %1129 = vmatprep.subr.bf16.mxu0 %v2997_v18  ;;  %v3106_v18 = vld [vmem:[#allocation7 + $0x218] ss:$24 sps:$4 sm:$0xff]  }
  0xc8   :  { %2181 = vmatpush1.bf16.msra.mxu1 %v3097_v11  ;;  %v3139_v11 = vld [vmem:[#allocation7 + $0x330] ss:$24 sps:$4 sm:$0xff]  }
  0xc9   :  { %2182 = vmatprep.subr.bf16.mxu1 %v3105_v13  ;;  %v3147_v13 = vld [vmem:[#allocation7 + $0x364] ss:$24 sps:$4 sm:$0xff]  }
  0xca   :  { %1130 = vmatpush1.bf16.msra.mxu0 %v2995_v19  ;;  %v3109_v19 = vld [vmem:[#allocation7 + $0x240] ss:$24 sps:$4 sm:$0xff]  }
  0xcb   :  { %1131 = vmatprep.subr.bf16.mxu0 %v3002_v22  ;;  %v3112_v22 = vld [vmem:[#allocation7 + $0x248] ss:$24 sps:$4 sm:$0xff]  }
  0xcc   :  { %2183 = vmatpush1.bf16.msra.mxu1 %v3103_v15  ;;  %v3356_v15 = vmov 0  }
  0xcd   :  { %2184 = vmatprep.subr.bf16.mxu1 %v3111_v17  ;;  %v3148_v17 = vld [vmem:[#allocation7 + $0x368] ss:$24 sps:$4 sm:$0xff]  }
  0xce   :  { %1132 = vmatpush1.bf16.msra.mxu0 %v3000_v23  ;;  %v3115_v23 = vld [vmem:[#allocation7 + $0x270] ss:$24 sps:$4 sm:$0xff]  }
  0xcf   :  { %1133 = vmatprep.subr.bf16.mxu0 %v3007_v24  ;;  %v3120_v24 = vld [vmem:[#allocation7 + $0x27c] ss:$24 sps:$4 sm:$0xff]  }
  0xd0   :  { %2185 = vmatpush1.bf16.msra.mxu1 %v3109_v19  ;;  %v3156_v19 = vld [vmem:[#allocation7 + $0x39c] ss:$24 sps:$4 sm:$0xff]  }
  0xd1   :  { %2186 = vmatprep.subr.bf16.mxu1 %v3117_v21  ;;  %v3154_v21 = vld [vmem:[#allocation7 + $0x398] ss:$24 sps:$4 sm:$0xff]  }
  0xd2   :  { %1134 = vmatpush1.bf16.msra.mxu0 %v3005_v25  ;;  %v3118_v25 = vld [vmem:[#allocation7 + $0x278] ss:$24 sps:$4 sm:$0xff]  }
  0xd3   :  { %1135 = vmatprep.subr.bf16.mxu0 %v3012_v26 }
  0xd4   :  { %2187 = vmatpush1.bf16.msra.mxu1 %v3115_v23  ;;  %v3162_v23 = vld [vmem:[#allocation7 + $0x3cc] ss:$24 sps:$4 sm:$0xff]  }
  0xd6   :  { %1136 = vmatpush1.bf16.msra.mxu0 %v3010_v27 }
  0xd7   :  { %1137 = vmatprep.subr.bf16.mxu0 %v3015_v28 }
  0xda   :  { %1138 = vmatpush1.bf16.msra.mxu0 %v3013_v29 }
  0xdb   :  { %1139 = vmatprep.subr.bf16.mxu0 %v3018_v30 }
  0xde   :  { %1140 = vmatpush1.bf16.msra.mxu0 %v3016_v31 }
  0xdf   :  { %1141 = vmatprep.subr.bf16.mxu0 %v3021_v32  ;;  %v3123_v32 = vld [vmem:[#allocation7 + $0x2a4] ss:$24 sps:$4 sm:$0xff]  }
  0xe0   :  { %2188 = vmatprep.subr.bf16.mxu1 %v3123_v32  ;;  %v3169_v32 = vld [vmem:[#allocation7 + $0x420] ss:$24 sps:$4 sm:$0xff]  }
  0xe2   :  { %1142 = vmatpush1.bf16.msra.mxu0 %v3019_v33  ;;  %v3126_v33 = vld [vmem:[#allocation7 + $0x2ac] ss:$24 sps:$4 sm:$0xff]  }
  0xe3   :  { %1143 = vmatprep.subr.bf16.mxu0 %v3024_v34  ;;  %v3121_v34 = vld [vmem:[#allocation7 + $0x2a0] ss:$24 sps:$4 sm:$0xff]  }
  0xe4   :  { %2189 = vmatpush1.bf16.msra.mxu1 %v3121_v34  ;;  %v3177_v34 = vld [vmem:[#allocation7 + $0x454] ss:$24 sps:$4 sm:$0xff]  }
  0xe6   :  { %1144 = vmatpush1.bf16.msra.mxu0 %v3022_v35  ;;  %v3124_v35 = vld [vmem:[#allocation7 + $0x2a8] ss:$24 sps:$4 sm:$0xff]  }
  0xe7   :  { %1145 = vmatprep.subr.bf16.mxu0 %v3027_v36  ;;  %v3129_v36 = vld [vmem:[#allocation7 + $0x2d4] ss:$24 sps:$4 sm:$0xff]  }
  0xe8   :  { %2190 = vmatprep.subr.bf16.mxu1 %v3129_v36  ;;  %v3175_v36 = vld [vmem:[#allocation7 + $0x450] ss:$24 sps:$4 sm:$0xff]  }
  0xea   :  { %1146 = vmatpush1.bf16.msra.mxu0 %v3025_v37  ;;  %v3132_v37 = vld [vmem:[#allocation7 + $0x2dc] ss:$24 sps:$4 sm:$0xff]  }
  0xeb   :  { %1147 = vmatprep.subr.bf16.mxu0 %v3030_v38  ;;  %v3127_v38 = vld [vmem:[#allocation7 + $0x2d0] ss:$24 sps:$4 sm:$0xff]  }
  0xec   :  { %2191 = vmatpush1.bf16.msra.mxu1 %v3127_v38  ;;  %v3183_v38 = vld [vmem:[#allocation7 + $0x14] ss:$24 sps:$4 sm:$0xff]  }
  0xed   :  { %2203 = vmatprep.subr.bf16.mxu1 %v3135_v40  ;;  %v3186_v40 = vld [vmem:[#allocation7 + $0x44] ss:$24 sps:$4 sm:$0xff]  }
  0xee   :  { %1148 = vmatpush1.bf16.msra.mxu0 %v3028_v41  ;;  %v3138_v41 = vld [vmem:[#allocation7 + $0x30c] ss:$24 sps:$4 sm:$0xff]  }
  0xef   :  { %1149 = vmatprep.subr.bf16.mxu0 %v3033_v42 }
  0xf2   :  { %1150 = vmatpush1.bf16.msra.mxu0 %v3031_v43 }
  0xf3   :  { %1151 = vmatprep.subr.bf16.mxu0 %v3036_v44 }
  0xf6   :  { %1152 = vmatpush1.bf16.msra.mxu0 %v3034_v45 }
  0xf7   :  { %2246 = vmatprep.subr.bf16.mxu0 %v3042_v46 }
  0xf9   :  { %1154 = vmatmul.mubr.bf16.vlgmr.msra.gmra.mrb[0].mxu0 %v3420_v62  ;;  %v3076_v62 = vld [vmem:[#allocation7 + $0x128] ss:$24 sps:$4 sm:$0xff]  }
  0xfa   :  { %2247 = vmatpush1.bf16.msra.mxu0 %v3040_v47 }
  0xfb   :  { %2248 = vmatprep.subr.bf16.mxu0 %v3048_v48 }
  0xfe   :  { %2249 = vmatpush1.bf16.msra.mxu0 %v3046_v49 }
  0xff   :  { %2250 = vmatprep.subr.bf16.mxu0 %v3054_v50 }
 0x102   :  { %2251 = vmatpush1.bf16.msra.mxu0 %v3052_v51 }
 0x103   :  { %2252 = vmatprep.subr.bf16.mxu0 %v3060_v52 }
 0x106   :  { %2253 = vmatpush1.bf16.msra.mxu0 %v3058_v53 }
 0x107   :  { %2254 = vmatprep.subr.bf16.mxu0 %v3066_v54 }
 0x10a   :  { %2255 = vmatpush1.bf16.msra.mxu0 %v3064_v55 }
 0x10b   :  { %2256 = vmatprep.subr.bf16.mxu0 %v3072_v56 }
 0x10e   :  { %2257 = vmatpush1.bf16.msra.mxu0 %v3070_v57 }
 0x10f   :  { %2258 = vmatprep.subr.bf16.mxu0 %v3078_v60 }
 0x112   :  { %2259 = vmatpush1.bf16.msra.mxu0 %v3076_v62 }
 0x113   :  { %2260 = vmatprep.subr.bf16.mxu0 %v3084_v0 }
 0x116   :  { %2261 = vmatpush1.bf16.msra.mxu0 %v3082_v2 }
 0x117   :  { %2262 = vmatprep.subr.bf16.mxu0 %v3090_v4 }
 0x11a   :  { %2263 = vmatpush1.bf16.msra.mxu0 %v3088_v6 }
 0x11b   :  { %2264 = vmatprep.subr.bf16.mxu0 %v3096_v8  ;;  %v3136_v8 = vld [vmem:[#allocation7 + $0x308] ss:$24 sps:$4 sm:$0xff]  }
 0x11e   :  { %2265 = vmatpush1.bf16.msra.mxu0 %v3094_v10  ;;  %v3144_v10 = vld [vmem:[#allocation7 + $0x33c] ss:$24 sps:$4 sm:$0xff]  }
 0x11f   :  { %2266 = vmatprep.subr.bf16.mxu0 %v3102_v12  ;;  %v3142_v12 = vld [vmem:[#allocation7 + $0x338] ss:$24 sps:$4 sm:$0xff]  }
 0x122   :  { %2267 = vmatpush1.bf16.msra.mxu0 %v3100_v14  ;;  %v3150_v14 = vld [vmem:[#allocation7 + $0x36c] ss:$24 sps:$4 sm:$0xff]  }
 0x123   :  { %2268 = vmatprep.subr.bf16.mxu0 %v3108_v16  ;;  %v3145_v16 = vld [vmem:[#allocation7 + $0x360] ss:$24 sps:$4 sm:$0xff]  }
 0x126   :  { %2269 = vmatpush1.bf16.msra.mxu0 %v3106_v18  ;;  %v3153_v18 = vld [vmem:[#allocation7 + $0x394] ss:$24 sps:$4 sm:$0xff]  }
 0x127   :  { %2270 = vmatprep.subr.bf16.mxu0 %v3114_v20  ;;  %v3151_v20 = vld [vmem:[#allocation7 + $0x390] ss:$24 sps:$4 sm:$0xff]  }
 0x12a   :  { %2271 = vmatpush1.bf16.msra.mxu0 %v3112_v22  ;;  %v3159_v22 = vld [vmem:[#allocation7 + $0x3c4] ss:$24 sps:$4 sm:$0xff]  }
 0x12b   :  { %2272 = vmatprep.subr.bf16.mxu0 %v3120_v24  ;;  %v3157_v24 = vld [vmem:[#allocation7 + $0x3c0] ss:$24 sps:$4 sm:$0xff]  }
 0x12e   :  { %2273 = vmatpush1.bf16.msra.mxu0 %v3118_v25  ;;  %v3160_v25 = vld [vmem:[#allocation7 + $0x3c8] ss:$24 sps:$4 sm:$0xff]  }
 0x12f   :  { %2274 = vmatprep.subr.bf16.mxu0 %v3126_v33  ;;  %v3172_v33 = vld [vmem:[#allocation7 + $0x428] ss:$24 sps:$4 sm:$0xff]  }
 0x132   :  { %v2764_v26 = vpop.f32.mrb[0].mxu1  ;;  %2275 = vmatpush1.bf16.msra.mxu0 %v3124_v35  ;;  %v3180_v35 = vld [vmem:[#allocation7 + $0x45c] ss:$24 sps:$4 sm:$0xff]  }
 0x133   :  { %v2765_v27 = vpop.f32.mrb[1].mxu1  ;;  %2276 = vmatprep.subr.bf16.mxu0 %v3132_v37  ;;  %v3178_v37 = vld [vmem:[#allocation7 + $0x458] ss:$24 sps:$4 sm:$0xff]  }
 0x134   :  { %v2766_v28 = vadd.f32 %v2765_v27, %v2764_v26  ;;  %v2767_v29 = vpop.f32.mrb[2].mxu1  ;;  %v3165_v26 = vld [vmem:[#allocation7 + $0x3f4] ss:$24 sps:$4 sm:$0xff]  }
 0x135   :  { %v2768_v30 = vpop.f32.mrb[3].mxu1  ;;  %v3168_v27 = vld [vmem:[#allocation7 + $0x3fc] ss:$24 sps:$4 sm:$0xff]  }
 0x136   :  { %v2769_v31 = vadd.f32 %v2768_v30, %v2767_v29  ;;  %2277 = vmatpush1.bf16.msra.mxu0 %v3130_v39  ;;  %v3166_v29 = vld [vmem:[#allocation7 + $0x3f8] ss:$24 sps:$4 sm:$0xff]   ;;  %v3171_v30 = vld [vmem:[#allocation7 + $0x424] ss:$24 sps:$4 sm:$0xff]  }
 0x137   :  { %2289 = vmatprep.subr.bf16.mxu0 %v3138_v41  ;;  %v3181_v39 = vld [vmem:[#allocation7 + $0x10] ss:$24 sps:$4 sm:$0xff]   ;;  %v3184_v41 = vld [vmem:[#allocation7 + $0x40] ss:$24 sps:$4 sm:$0xff]  }
 0x152   :  { %v2786_v42 = vpop.f32.mrb[4].mxu1 }
 0x153   :  { %v2787_v43 = vpop.f32.mrb[5].mxu1 }
 0x154   :  { %v2788_v44 = vadd.f32 %v2787_v43, %v2786_v42  ;;  %v2789_v45 = vpop.f32.mrb[6].mxu1  ;;  %v3189_v42 = vld [vmem:[#allocation7 + $0x74] ss:$24 sps:$4 sm:$0xff]   ;;  %v3187_v43 = vld [vmem:[#allocation7 + $0x70] ss:$24 sps:$4 sm:$0xff]  }
 0x155   :  { %v2790_v46 = vpop.f32.mrb[7].mxu1 }
 0x156   :  { %v1240_v47 = vadd.f32 %v2788_v44, %v2766_v28  ;;  %v2791_v48 = vadd.f32 %v2790_v46, %v2789_v45  ;;  %v3163_v28 = vld [vmem:[#allocation7 + $0x3f0] ss:$24 sps:$4 sm:$0xff]   ;;  %v3192_v44 = vld [vmem:[#allocation7 + $0xa4] ss:$24 sps:$4 sm:$0xff]   ;;  %v3190_v45 = vld [vmem:[#allocation7 + $0xa0] ss:$24 sps:$4 sm:$0xff]  }
 0x157   :  { %v3195_v46 = vld [vmem:[#allocation7 + $0xd4] ss:$24 sps:$4 sm:$0xff]  }
 0x158   :  { %v1243_v49 = vadd.f32 %v2791_v48, %v2769_v31  ;;  %v3174_v31 = vld [vmem:[#allocation7 + $0x42c] ss:$24 sps:$4 sm:$0xff]  }
 0x159   :  { %v3198_v48 = vld [vmem:[#allocation7 + $0x104] ss:$24 sps:$4 sm:$0xff]  }
 0x172   :  { %v2808_v50 = vpop.f32.mrb[8].mxu1 }
 0x173   :  { %v2809_v51 = vpop.f32.mrb[9].mxu1 }
 0x174   :  { %v2810_v52 = vadd.f32 %v2809_v51, %v2808_v50  ;;  %v2811_v53 = vpop.f32.mrb[10].mxu1  ;;  %v3201_v50 = vld [vmem:[#allocation7 + $0x134] ss:$24 sps:$4 sm:$0xff]   ;;  %v3199_v51 = vld [vmem:[#allocation7 + $0x130] ss:$24 sps:$4 sm:$0xff]  }
 0x175   :  { %v2812_v54 = vpop.f32.mrb[11].mxu1 }
 0x176   :  { %v1281_v55 = vadd.f32 %v2810_v52, %v1240_v47  ;;  %v2813_v56 = vadd.f32 %v2812_v54, %v2811_v53  ;;  %v3193_v47 = vld [vmem:[#allocation7 + $0xd0] ss:$24 sps:$4 sm:$0xff]   ;;  %v3204_v52 = vld [vmem:[#allocation7 + $0x164] ss:$24 sps:$4 sm:$0xff]   ;;  %v3202_v53 = vld [vmem:[#allocation7 + $0x160] ss:$24 sps:$4 sm:$0xff]  }
 0x177   :  { %v3207_v54 = vld [vmem:[#allocation7 + $0x194] ss:$24 sps:$4 sm:$0xff]  }
 0x178   :  { %v1289_v57 = vmax.f32 %v1281_v55, 0.0  ;;  %v1284_v58 = vadd.f32 %v2813_v56, %v1243_v49  ;;  %v3196_v49 = vld [vmem:[#allocation7 + $0x100] ss:$24 sps:$4 sm:$0xff]   ;;  %v3205_v55 = vld [vmem:[#allocation7 + $0x190] ss:$24 sps:$4 sm:$0xff]  }
 0x179   :  { %v3210_v56 = vld [vmem:[#allocation7 + $0x1c4] ss:$24 sps:$4 sm:$0xff]  }
 0x17a   :  { %v1292_v59 = vmax.f32 %v1284_v58, 0.0  ;;  %v3213_v58 = vld [vmem:[#allocation7 + $0x1f4] ss:$24 sps:$4 sm:$0xff]  }
 0x17c   :  { %v3425_v60 = vpack.c.bf16 %v1292_v59, %v1289_v57  ;;  %v3208_v57 = vld [vmem:[#allocation7 + $0x1c0] ss:$24 sps:$4 sm:$0xff]   ;;  %v3211_v59 = vld [vmem:[#allocation7 + $0x1f0] ss:$24 sps:$4 sm:$0xff]  }
 0x1cc   :  { %v1155_v61 = vpop.f32.mrb[0].mxu0 }
 0x1cd   :  { %v1157_v62 = vpop.f32.mrb[1].mxu0  ;;  %v1287_v0 = vmax.f32 %v1155_v61, 0.0  ;;  %v3216_v61 = vld [vmem:[#allocation7 + $0x224] ss:$24 sps:$4 sm:$0xff]  }
 0x1ce   :  { %v1159_v63 = vpop.f32.mrb[2].mxu0  ;;  %v1288_v3 = vmax.f32 %v1157_v62, 0.0  ;;  %v3214_v62 = vld [vmem:[#allocation7 + $0x220] ss:$24 sps:$4 sm:$0xff]  }
 0x1cf   :  { %v1290_v1 = vmax.f32 %v1159_v63, 0.0  ;;  %v1161_v2 = vpop.f32.mrb[3].mxu0  ;;  %v3219_v63 = vld [vmem:[#allocation7 + $0x254] ss:$24 sps:$4 sm:$0xff]  }
 0x1d0   :  { %v1291_v4 = vmax.f32 %v1161_v2, 0.0  ;;  %v3220_v2 = vld [vmem:[#allocation7 + $0x280] ss:$24 sps:$4 sm:$0xff]  }
 0x1d1   :  { %v3427_v5 = vpack.c.bf16 %v1290_v1, %v1287_v0  ;;  %v3217_v0 = vld [vmem:[#allocation7 + $0x250] ss:$24 sps:$4 sm:$0xff]   ;;  %v3222_v1 = vld [vmem:[#allocation7 + $0x284] ss:$24 sps:$4 sm:$0xff]  }
 0x1d2   :  { %v3429_v6 = vpack.c.bf16 %v1291_v4, %v1288_v3  ;;  %v3225_v3 = vld [vmem:[#allocation7 + $0x2b4] ss:$24 sps:$4 sm:$0xff]   ;;  %v3223_v4 = vld [vmem:[#allocation7 + $0x2b0] ss:$24 sps:$4 sm:$0xff]  }
 0x1d4   :  { %2192 = vmatprep.mubr.bf16.mxu1 %v3429_v6  ;;  %2278 = vmatprep.mubr.bf16.mxu0 %v3429_v6 }
 0x1d5   :  { %2193 = vmatmul.mubr.bf16.vlgmr.msra.gmra.mrb[12].mxu1 %v3427_v5  ;;  %2279 = vmatmul.mubr.bf16.vlgmr.msra.gmra.mrb[4].mxu0 %v3427_v5 }
 0x1d6   :  { %2204 = vmatpush1.bf16.msra.mxu1 %v3133_v7  ;;  %2290 = vmatpush1.bf16.msra.mxu0 %v3136_v8  ;;  %v3226_v7 = vld [vmem:[#allocation7 + $0x2e0] ss:$24 sps:$4 sm:$0xff]   ;;  %v3231_v8 = vld [vmem:[#allocation7 + $0x314] ss:$24 sps:$4 sm:$0xff]  }
 0x1d7   :  { %2205 = vmatprep.subr.bf16.mxu1 %v3141_v9  ;;  %2291 = vmatprep.subr.bf16.mxu0 %v3144_v10  ;;  %v3229_v9 = vld [vmem:[#allocation7 + $0x310] ss:$24 sps:$4 sm:$0xff]   ;;  %v3234_v10 = vld [vmem:[#allocation7 + $0x344] ss:$24 sps:$4 sm:$0xff]  }
 0x1d8   :  { %2235 = vmatprep.mubr.bf16.mxu1 %v3356_v15  ;;  %2321 = vmatprep.mubr.bf16.mxu0 %v3356_v15 }
 0x1da   :  { %2206 = vmatpush1.bf16.msra.mxu1 %v3139_v11  ;;  %2292 = vmatpush1.bf16.msra.mxu0 %v3142_v12  ;;  %v3232_v11 = vld [vmem:[#allocation7 + $0x340] ss:$24 sps:$4 sm:$0xff]   ;;  %v3237_v12 = vld [vmem:[#allocation7 + $0x374] ss:$24 sps:$4 sm:$0xff]  }
 0x1db   :  { %2207 = vmatprep.subr.bf16.mxu1 %v3147_v13  ;;  %2293 = vmatprep.subr.bf16.mxu0 %v3150_v14  ;;  %v3235_v13 = vld [vmem:[#allocation7 + $0x370] ss:$24 sps:$4 sm:$0xff]   ;;  %v3240_v14 = vld [vmem:[#allocation7 + $0x3a4] ss:$24 sps:$4 sm:$0xff]  }
 0x1de   :  { %2208 = vmatpush1.bf16.msra.mxu1 %v3145_v16  ;;  %2294 = vmatpush1.bf16.msra.mxu0 %v3148_v17  ;;  %v3238_v16 = vld [vmem:[#allocation7 + $0x3a0] ss:$24 sps:$4 sm:$0xff]   ;;  %v3243_v17 = vld [vmem:[#allocation7 + $0x3d4] ss:$24 sps:$4 sm:$0xff]  }
 0x1df   :  { %2209 = vmatprep.subr.bf16.mxu1 %v3153_v18  ;;  %2295 = vmatprep.subr.bf16.mxu0 %v3156_v19  ;;  %v3241_v18 = vld [vmem:[#allocation7 + $0x3d0] ss:$24 sps:$4 sm:$0xff]   ;;  %v3246_v19 = vld [vmem:[#allocation7 + $0x404] ss:$24 sps:$4 sm:$0xff]  }
 0x1e2   :  { %2210 = vmatpush1.bf16.msra.mxu1 %v3151_v20  ;;  %2296 = vmatpush1.bf16.msra.mxu0 %v3154_v21  ;;  %v3249_v20 = vld [vmem:[#allocation7 + $0x434] ss:$24 sps:$4 sm:$0xff]   ;;  %v3252_v21 = vld [vmem:[#allocation7 + $0x464] ss:$24 sps:$4 sm:$0xff]  }
 0x1e3   :  { %2211 = vmatprep.subr.bf16.mxu1 %v3159_v22  ;;  %2297 = vmatprep.subr.bf16.mxu0 %v3162_v23  ;;  %v3250_v22 = vld [vmem:[#allocation7 + $0x460] ss:$24 sps:$4 sm:$0xff]  }
 0x1e6   :  { %2212 = vmatpush1.bf16.msra.mxu1 %v3157_v24  ;;  %2298 = vmatpush1.bf16.msra.mxu0 %v3160_v25 }
 0x1e7   :  { %2213 = vmatprep.subr.bf16.mxu1 %v3165_v26  ;;  %2299 = vmatprep.subr.bf16.mxu0 %v3168_v27 }
 0x1ea   :  { %2214 = vmatpush1.bf16.msra.mxu1 %v3163_v28  ;;  %2300 = vmatpush1.bf16.msra.mxu0 %v3166_v29 }
 0x1eb   :  { %2215 = vmatprep.subr.bf16.mxu1 %v3171_v30  ;;  %2301 = vmatprep.subr.bf16.mxu0 %v3174_v31 }
 0x1ee   :  { %2216 = vmatpush1.bf16.msra.mxu1 %v3169_v32  ;;  %2302 = vmatpush1.bf16.msra.mxu0 %v3172_v33 }
 0x1ef   :  { %2217 = vmatprep.subr.bf16.mxu1 %v3177_v34  ;;  %2303 = vmatprep.subr.bf16.mxu0 %v3180_v35 }
 0x1f2   :  { %2218 = vmatpush1.bf16.msra.mxu1 %v3175_v36  ;;  %2304 = vmatpush1.bf16.msra.mxu0 %v3178_v37 }
 0x1f3   :  { %2332 = vmatprep.subr.bf16.mxu1 %v3183_v38 }
 0x1f5   :  { %2236 = vmatmul.mubr.bf16.vlgmr.msra.gmra.mrb[12].mxu1 %v3425_v60  ;;  %2322 = vmatmul.mubr.bf16.vlgmr.msra.gmra.mrb[4].mxu0 %v3425_v60 }
 0x1f6   :  { %2333 = vmatpush1.bf16.msra.mxu1 %v3181_v39  ;;  %2364 = vmatprep.mubr.bf16.mxu1 %v3429_v6  ;;  %v3228_v6 = vld [vmem:[#allocation7 + $0x2e4] ss:$24 sps:$4 sm:$0xff]  }
 0x1f7   :  { %2334 = vmatprep.subr.bf16.mxu1 %v3186_v40 }
 0x1fa   :  { %2335 = vmatpush1.bf16.msra.mxu1 %v3184_v41 }
 0x1fb   :  { %2336 = vmatprep.subr.bf16.mxu1 %v3189_v42 }
 0x1fe   :  { %2337 = vmatpush1.bf16.msra.mxu1 %v3187_v43 }
 0x1ff   :  { %2338 = vmatprep.subr.bf16.mxu1 %v3192_v44 }
 0x202   :  { %2339 = vmatpush1.bf16.msra.mxu1 %v3190_v45 }
 0x203   :  { %2340 = vmatprep.subr.bf16.mxu1 %v3195_v46 }
 0x206   :  { %2341 = vmatpush1.bf16.msra.mxu1 %v3193_v47 }
 0x207   :  { %2342 = vmatprep.subr.bf16.mxu1 %v3198_v48 }
 0x20a   :  { %2343 = vmatpush1.bf16.msra.mxu1 %v3196_v49 }
 0x20b   :  { %2344 = vmatprep.subr.bf16.mxu1 %v3201_v50 }
 0x20e   :  { %2345 = vmatpush1.bf16.msra.mxu1 %v3199_v51 }
 0x20f   :  { %2346 = vmatprep.subr.bf16.mxu1 %v3204_v52 }
 0x212   :  { %2347 = vmatpush1.bf16.msra.mxu1 %v3202_v53 }
 0x213   :  { %2348 = vmatprep.subr.bf16.mxu1 %v3207_v54 }
 0x216   :  { %2349 = vmatpush1.bf16.msra.mxu1 %v3205_v55 }
 0x217   :  { %2350 = vmatprep.subr.bf16.mxu1 %v3210_v56 }
 0x21a   :  { %2351 = vmatpush1.bf16.msra.mxu1 %v3208_v57 }
 0x21b   :  { %2352 = vmatprep.subr.bf16.mxu1 %v3213_v58 }
 0x21e   :  { %2353 = vmatpush1.bf16.msra.mxu1 %v3211_v59 }
 0x21f   :  { %2354 = vmatprep.subr.bf16.mxu1 %v3216_v61 }
 0x222   :  { %2355 = vmatpush1.bf16.msra.mxu1 %v3214_v62 }
 0x223   :  { %2356 = vmatprep.subr.bf16.mxu1 %v3219_v63 }
 0x226   :  { %2357 = vmatpush1.bf16.msra.mxu1 %v3217_v0 }
 0x227   :  { %2358 = vmatprep.subr.bf16.mxu1 %v3222_v1 }
 0x22a   :  { %2359 = vmatpush1.bf16.msra.mxu1 %v3220_v2 }
 0x22b   :  { %2360 = vmatprep.subr.bf16.mxu1 %v3225_v3 }
 0x22e   :  { %2361 = vmatpush1.bf16.msra.mxu1 %v3223_v4 }
 0x22f   :  { %2362 = vmatprep.subr.bf16.mxu1 %v3228_v6 }
 0x232   :  { %2363 = vmatpush1.bf16.msra.mxu1 %v3226_v7 }
 0x233   :  { %2375 = vmatprep.subr.bf16.mxu1 %v3231_v8 }
 0x235   :  { %2365 = vmatmul.mubr.bf16.vlgmr.msra.gmra.mrb[16].mxu1 %v3427_v5  ;;  %v3244_v5 = vld [vmem:[#allocation7 + $0x400] ss:$24 sps:$4 sm:$0xff]  }
 0x236   :  { %2376 = vmatpush1.bf16.msra.mxu1 %v3229_v9  ;;  %2407 = vmatprep.mubr.bf16.mxu1 %v3356_v15  ;;  %v3247_v15 = vld [vmem:[#allocation7 + $0x430] ss:$24 sps:$4 sm:$0xff]  }
 0x237   :  { %2377 = vmatprep.subr.bf16.mxu1 %v3234_v10 }
 0x23a   :  { %2378 = vmatpush1.bf16.msra.mxu1 %v3232_v11 }
 0x23b   :  { %2379 = vmatprep.subr.bf16.mxu1 %v3237_v12 }
 0x23e   :  { %2380 = vmatpush1.bf16.msra.mxu1 %v3235_v13 }
 0x23f   :  { %2381 = vmatprep.subr.bf16.mxu1 %v3240_v14 }
 0x242   :  { %2382 = vmatpush1.bf16.msra.mxu1 %v3238_v16 }
 0x243   :  { %2383 = vmatprep.subr.bf16.mxu1 %v3243_v17 }
 0x246   :  { %2384 = vmatpush1.bf16.msra.mxu1 %v3241_v18 }
 0x247   :  { %2385 = vmatprep.subr.bf16.mxu1 %v3246_v19 }
 0x24a   :  { %2386 = vmatpush1.bf16.msra.mxu1 %v3244_v5 }
 0x24b   :  { %2387 = vmatprep.subr.bf16.mxu1 %v3249_v20 }
 0x24e   :  { %2388 = vmatpush1.bf16.msra.mxu1 %v3247_v15 }
 0x24f   :  { %2389 = vmatprep.subr.bf16.mxu1 %v3252_v21 }
 0x252   :  { %2390 = vmatpush1.bf16.msra.mxu1 %v3250_v22 }
 0x255   :  { %2408 = vmatmul.mubr.bf16.vlgmr.msra.gmra.mrb[16].mxu1 %v3425_v60 }
 0x2c8   :  { %v2237_v23 = vpop.f32.mrb[12].mxu1  ;;  %v2323_v24 = vpop.f32.mrb[4].mxu0 }
 0x2c9   :  { %v2418_v25 = vmax.f32 %v2237_v23, 0.0  ;;  %v2420_v26 = vmax.f32 %v2323_v24, 0.0  ;;  %v2239_v27 = vpop.f32.mrb[13].mxu1  ;;  %v2325_v28 = vpop.f32.mrb[5].mxu0 }
 0x2ca   :  { %v2419_v29 = vmax.f32 %v2239_v27, 0.0  ;;  %v2421_v30 = vmax.f32 %v2325_v28, 0.0  ;;  %v2241_v31 = vpop.f32.mrb[14].mxu1  ;;  %v2327_v32 = vpop.f32.mrb[6].mxu0 }
 0x2cb   :  { %2430 = vst [vmem:[#allocation8] sm:$0xff] %v2418_v25  ;;  %2432 = vst [vmem:[#allocation8 + $0x10] sm:$0xff] %v2420_v26  ;;  %v2424_v33 = vmax.f32 %v2241_v31, 0.0  ;;  %v2426_v34 = vmax.f32 %v2327_v32, 0.0  ;;  %v2243_v35 = vpop.f32.mrb[15].mxu1  ;;  %v2329_v36 = vpop.f32.mrb[7].mxu0 }
 0x2cc   :  { %2431 = vst [vmem:[#allocation8 + $0x8] sm:$0xff] %v2419_v29  ;;  %2433 = vst [vmem:[#allocation8 + $0x18] sm:$0xff] %v2421_v30  ;;  %v2425_v37 = vmax.f32 %v2243_v35, 0.0  ;;  %v2427_v60 = vmax.f32 %v2329_v36, 0.0 }
 0x2cd   :  { %2436 = vst [vmem:[#allocation8 + $0x30] sm:$0xff] %v2424_v33  ;;  %2438 = vst [vmem:[#allocation8 + $0x40] sm:$0xff] %v2426_v34 }
 0x2ce   :  { %2437 = vst [vmem:[#allocation8 + $0x38] sm:$0xff] %v2425_v37  ;;  %2439 = vst [vmem:[#allocation8 + $0x48] sm:$0xff] %v2427_v60 }
 0x328   :  { %v2409_v38 = vpop.f32.mrb[16].mxu1 }
 0x329   :  { %v2422_v39 = vmax.f32 %v2409_v38, 0.0  ;;  %v2411_v40 = vpop.f32.mrb[17].mxu1 }
 0x32a   :  { %v2423_v41 = vmax.f32 %v2411_v40, 0.0  ;;  %v2413_v42 = vpop.f32.mrb[18].mxu1 }
 0x32b   :  { %2434 = vst [vmem:[#allocation8 + $0x20] sm:$0xff] %v2422_v39  ;;  %v2428_v43 = vmax.f32 %v2413_v42, 0.0  ;;  %v2415_v44 = vpop.f32.mrb[19].mxu1 }
 0x32c   :  { %2435 = vst [vmem:[#allocation8 + $0x28] sm:$0xff] %v2423_v41  ;;  %v2429_v45 = vmax.f32 %v2415_v44, 0.0 }
 0x32d   :  { %2440 = vst [vmem:[#allocation8 + $0x50] sm:$0xff] %v2428_v43 }
 0x32e   :  { %2441 = vst [vmem:[#allocation8 + $0x58] sm:$0xff] %v2429_v45 }
 0x32f   :  { %3330 = shalt.err (!%p3327_p0)
}
 0x330   :  { %s3331_s29 = scalar_lea.hbm %s3461_s3, 1536 }
 0x331   :  { %p3332_p1 = scmp.ne.s32.totalorder %s3461_s3, %s3331_s29  ;;  %p3335_p2 = scmp.lt.u32.totalorder %s3331_s29, %s3461_s3 }
 0x333   :  { %p3337_p3 = pnand %p3335_p2, %p3332_p1 }
 0x335   :  { %3340 = shalt.err (!%p3337_p3)
}
 0x336   :  { %2453 = dma.vmem_to_hbm [thread:$0]  %s2448_s25, 1536, %s3461_s3, [#allocation4], %s3351_s1, %s3351_s1, %s3352_s9  }
 0x337   :  { %3345 = dma.done.wait [#allocation4], 1536  }
 0x338   :  { %3346 = vsyncadd [#allocation4], 4294965760 }
 0x339   :  { %2457 = vsyncpa [#allocation3], 1 }
 0x33a   :  { %2458 = vsyncpa [#allocation6], 1 }
 0x33b   :  { %2459 = vsyncpa [#allocation4], 1 }

</bundles_post_ra>
